<compile_context>
chip_gen: v5e
topology: v5e:2x2
jax: 0.10.0
libtpu: 0.0.40
codegen_flags: <defaults>
</compile_context>

<pallas_src>
import functools

import jax
import jax.numpy as jnp
from jax import lax
from jax.experimental import pallas as pl
from jax.experimental.pallas import tpu as pltpu


def _round_up(x, m):
    return (x + m - 1) // m * m


def _mlp_kernel(n_hidden, x_ref, *refs):
    """Fused MLP in transposed (features-on-sublanes, batch-on-lanes) layout.

    refs = (w0, b0, w1, b1, ..., w_{H-1}, b_{H-1}, w_out, b_out, out_ref)

      x_ref  : (block_batch, in_dim)   f32   (raw input tile; cast here)
      w_i    : (out_i, in_i)           bf16  (PyTorch weight layout)
      b_i    : (out_i, 1)              f32
      w_out  : (last_hidden, 1)        f32
      b_out  : (1, 1)                  f32   (SMEM scalar)
      out_ref: (1, block_batch)        f32   (lane-dense output row)
    """
    out_ref = refs[-1]
    p = refs[:-1]

    # Cast x to bf16 in-kernel: x is the only batch-sized HBM stream, read
    # exactly once as f32 (no separate wrapper pad/cast pass over HBM).
    x = x_ref[...].astype(jnp.bfloat16)               # (bb, in)   bf16

    # Layer 0: h^T = relu(W0 @ x^T + b0).  x^T is folded into the contraction
    # (A @ B^T pattern), so no batch-sized transpose in the wrapper.
    # TODO(synk): check pl.lower_as_mlir that Mosaic feeds the transposed rhs
    # to the MXU without a per-step XLU relayout of the x tile.
    w0 = p[0][...]                                    # (out0, in) bf16
    b0 = p[1][...]                                    # (out0, 1)  f32
    h = lax.dot_general(w0, x, (((1,), (1,)), ((), ())),
                        preferred_element_type=jnp.float32)
    h = jnp.maximum(h + b0, 0.0)                      # (out0, bb) f32

    # Hidden layers 1..H-1: bf16 MXU matmuls, f32 accumulate / bias / ReLU.
    for i in range(1, n_hidden):
        w = p[2 * i][...]                             # (out_i, in_i) bf16
        b = p[2 * i + 1][...]                         # (out_i, 1)    f32
        h = jnp.dot(w, h.astype(jnp.bfloat16),
                    preferred_element_type=jnp.float32)
        h = jnp.maximum(h + b, 0.0)                   # (out_i, bb) f32

    # Final Linear(last_hidden, 1): VPU multiply + cross-sublane reduce.
    # Produces a lane-dense (1, block_batch) row -> unmasked full-width store.
    w_out = p[2 * n_hidden][...]                      # (last_hidden, 1) f32
    b_out = p[2 * n_hidden + 1][0, 0]                 # scalar (SMEM)
    out = jnp.sum(h * w_out, axis=0, keepdims=True) + b_out
    out_ref[...] = out.astype(out_ref.dtype)


def mlp_forward(x, weights, biases, *, block_batch=1024):
    """Run the fused MLP Pallas kernel.

    x:       (B, input_size) float32
    weights: PyTorch-layout weights, W_i of shape (out_i, in_i)
    biases:  b_i of shape (out_i,)
    returns: (B, 1) float32
    """
    B, in_dim = x.shape
    n_linear = len(weights)
    n_hidden = n_linear - 1
    assert n_hidden >= 1

    # Large 128-aligned batch tile, capped so the grid has at least 2 blocks
    # whenever the batch allows it (v7x megacore: "parallel" axis sharded
    # across the two TensorCores); tiny batches still get a single 128 tile.
    B_ceil = _round_up(B, 128)
    two_block_cap = _round_up(pl.cdiv(B_ceil, 2), 128)
    bb = min(_round_up(max(block_batch, 128), 128), two_block_cap)
    num_blocks = pl.cdiv(B, bb)   # partial tail block is clipped by Pallas

    params = []
    in_specs = [pl.BlockSpec((bb, in_dim), lambda i: (i, 0))]
    # Hidden layers: bf16 weights for the MXU, f32 column biases (VMEM).
    for li in range(n_hidden):
        w = weights[li].astype(jnp.bfloat16)                    # (out, in)
        b = biases[li].astype(jnp.float32).reshape(-1, 1)       # (out, 1)
        params += [w, b]
        in_specs.append(pl.BlockSpec(w.shape, lambda i: (0, 0)))
        in_specs.append(pl.BlockSpec(b.shape, lambda i: (0, 0)))
    # Output layer: f32 for the VPU multiply-reduce path; scalar bias in SMEM.
    w_out = weights[-1].astype(jnp.float32).reshape(-1, 1)      # (last_hidden, 1)
    b_out = biases[-1].astype(jnp.float32).reshape(1, 1)        # (1, 1)
    params += [w_out, b_out]
    in_specs.append(pl.BlockSpec(w_out.shape, lambda i: (0, 0)))
    in_specs.append(pl.BlockSpec(memory_space=pltpu.MemorySpace.SMEM))

    out_specs = pl.BlockSpec((1, bb), lambda i: (0, i))

    flops = int(2 * B * sum(int(w.shape[0]) * int(w.shape[1])
                            for w in weights))
    bytes_accessed = int(B * in_dim * 4
                         + sum(int(p.size) * int(p.dtype.itemsize)
                               for p in params)
                         + B * 4)

    kernel = functools.partial(_mlp_kernel, n_hidden)

    out = pl.pallas_call(
        kernel,
        out_shape=jax.ShapeDtypeStruct((1, B), jnp.float32),
        grid=(num_blocks,),
        in_specs=in_specs,
        out_specs=out_specs,
        compiler_params=pltpu.CompilerParams(
            dimension_semantics=("parallel",)),
        cost_estimate=pl.CostEstimate(
            flops=flops, transcendentals=0, bytes_accessed=bytes_accessed),
    )(x.astype(jnp.float32), *params)

    return out[0, :].reshape(B, 1)


def init_params(key, input_size, num_layers, units):
    """PyTorch-style Linear init: W (out, in), b (out,), U(-1/sqrt(fan_in), +)."""
    dims = [input_size] + list(units) + [1]
    weights, biases = [], []
    for i in range(len(dims) - 1):
        fan_in, fan_out = dims[i], dims[i + 1]
        key, kw, kb = jax.random.split(key, 3)
        bound = 1.0 / jnp.sqrt(jnp.float32(fan_in))
        w = jax.random.uniform(kw, (fan_out, fan_in), jnp.float32, -bound, bound)
        b = jax.random.uniform(kb, (fan_out,), jnp.float32, -bound, bound)
        weights.append(w)
        biases.append(b)
    return weights, biases


def mlp_reference(x, weights, biases, *, matmul_dtype=jnp.float32):
    """Pure-JAX reference matching the PyTorch forward.

    matmul_dtype=bfloat16 emulates the kernel's mixed precision (bf16 MXU
    operands with f32 accumulation, f32 bias/ReLU, f32 final layer).
    """
    h = x.astype(jnp.float32)
    n = len(weights)
    for i, (w, b) in enumerate(zip(weights, biases)):
        if i < n - 1:
            h = jnp.dot(h.astype(matmul_dtype), w.astype(matmul_dtype).T,
                        preferred_element_type=jnp.float32)
            h = jnp.maximum(h + b.astype(jnp.float32), 0.0)
        else:
            h = jnp.dot(h, w.astype(jnp.float32).T,
                        preferred_element_type=jnp.float32)
            h = h + b.astype(jnp.float32)
    return h


if __name__ == "__main__":
    # Small, module-consistent shapes; optuna-chosen hyperparams are fixed here.
    input_size = 32
    num_layers = 3
    units = [64, 48, 32]

    key = jax.random.PRNGKey(0)
    weights, biases = init_params(key, input_size, num_layers, units)

    for batch in (200, 300):   # non-128-multiple batches -> clipped tail block
        key, kx = jax.random.split(key)
        x = jax.random.normal(kx, (batch, input_size), jnp.float32)

        out = mlp_forward(x, weights, biases)
        out = jax.block_until_ready(out)
        assert out.shape == (batch, 1), out.shape

        ref_mixed = mlp_reference(x, weights, biases, matmul_dtype=jnp.bfloat16)
        ref_f32 = mlp_reference(x, weights, biases, matmul_dtype=jnp.float32)
        assert jnp.allclose(out, ref_mixed, atol=2e-3, rtol=2e-3), (
            "Pallas MLP mismatch vs mixed-precision reference")
        assert jnp.allclose(out, ref_f32, atol=7e-2, rtol=7e-2), (
            "Pallas MLP mismatch vs f32 reference")

    print("KERNEL_OK")
</pallas_src>

<mosaic_0001>
module attributes {stable_mosaic.version = 11 : i64} {
  func.func @_mlp_kernel(%arg0: i32, %arg1: memref<128x32xf32, #tpu.memory_space<vmem>>, %arg2: memref<64x32xbf16, #tpu.memory_space<vmem>>, %arg3: memref<64x1xf32, #tpu.memory_space<vmem>>, %arg4: memref<48x64xbf16, #tpu.memory_space<vmem>>, %arg5: memref<48x1xf32, #tpu.memory_space<vmem>>, %arg6: memref<32x48xbf16, #tpu.memory_space<vmem>>, %arg7: memref<32x1xf32, #tpu.memory_space<vmem>>, %arg8: memref<32x1xf32, #tpu.memory_space<vmem>>, %arg9: memref<1x1xf32, #tpu.memory_space<smem>>, %arg10: memref<1x128xf32, #tpu.memory_space<vmem>>) attributes {dimension_semantics = [#tpu.dimension_semantics<parallel>], iteration_bounds = array<i64: 2>, scalar_prefetch = 0 : i64, scratch_operands = 0 : i64, tpu.core_type = #tpu.core_type<tc>, window_params = [{transform_indices = @transform_0, window_bounds = array<i64: 128, 32>}, {pipeline_mode = #tpu.pipeline_mode<synchronous>, transform_indices = @transform_1, window_bounds = array<i64: 64, 32>}, {pipeline_mode = #tpu.pipeline_mode<synchronous>, transform_indices = @transform_2, window_bounds = array<i64: 64, 1>}, {pipeline_mode = #tpu.pipeline_mode<synchronous>, transform_indices = @transform_3, window_bounds = array<i64: 48, 64>}, {pipeline_mode = #tpu.pipeline_mode<synchronous>, transform_indices = @transform_4, window_bounds = array<i64: 48, 1>}, {pipeline_mode = #tpu.pipeline_mode<synchronous>, transform_indices = @transform_5, window_bounds = array<i64: 32, 48>}, {pipeline_mode = #tpu.pipeline_mode<synchronous>, transform_indices = @transform_6, window_bounds = array<i64: 32, 1>}, {pipeline_mode = #tpu.pipeline_mode<synchronous>, transform_indices = @transform_7, window_bounds = array<i64: 32, 1>}, {transform_indices = @transform_8, window_bounds = array<i64: 1, 1>}, {transform_indices = @transform_9, window_bounds = array<i64: 1, 128>}]} {
    %c0 = arith.constant 0 : index
    %c0_0 = arith.constant 0 : index
    %0 = vector.load %arg1[%c0, %c0_0] : memref<128x32xf32, #tpu.memory_space<vmem>>, vector<128x32xf32>
    %1 = arith.truncf %0 : vector<128x32xf32> to vector<128x32xbf16>
    %c0_1 = arith.constant 0 : index
    %c0_2 = arith.constant 0 : index
    %2 = vector.load %arg2[%c0_1, %c0_2] : memref<64x32xbf16, #tpu.memory_space<vmem>>, vector<64x32xbf16>
    %c0_3 = arith.constant 0 : index
    %c0_4 = arith.constant 0 : index
    %3 = vector.load %arg3[%c0_3, %c0_4] : memref<64x1xf32, #tpu.memory_space<vmem>>, vector<64x1xf32>
    %cst = arith.constant dense<0.000000e+00> : vector<64x128xf32>
    %4 = tpu.matmul %2, %1, %cst {dimension_numbers = #tpu.dot_dimension_numbers<[1], [1], [0], [0], [0, 0, 1, 0], [], []>} : vector<64x32xbf16>, vector<128x32xbf16>, vector<64x128xf32> -> vector<64x128xf32>
    %5 = vector.broadcast %3 : vector<64x1xf32> to vector<64x128xf32>
    %6 = arith.addf %4, %5 : vector<64x128xf32>
    %cst_5 = arith.constant 0.000000e+00 : f32
    %7 = vector.broadcast %cst_5 : f32 to vector<64x128xf32>
    %8 = arith.maximumf %6, %7 : vector<64x128xf32>
    %c0_6 = arith.constant 0 : index
    %c0_7 = arith.constant 0 : index
    %9 = vector.load %arg4[%c0_6, %c0_7] : memref<48x64xbf16, #tpu.memory_space<vmem>>, vector<48x64xbf16>
    %c0_8 = arith.constant 0 : index
    %c0_9 = arith.constant 0 : index
    %10 = vector.load %arg5[%c0_8, %c0_9] : memref<48x1xf32, #tpu.memory_space<vmem>>, vector<48x1xf32>
    %11 = arith.truncf %8 : vector<64x128xf32> to vector<64x128xbf16>
    %cst_10 = arith.constant dense<0.000000e+00> : vector<48x128xf32>
    %12 = tpu.matmul %9, %11, %cst_10 {dimension_numbers = #tpu.dot_dimension_numbers<[1], [0], [0], [1], [0, 0, 1, 1], [], []>} : vector<48x64xbf16>, vector<64x128xbf16>, vector<48x128xf32> -> vector<48x128xf32>
    %13 = vector.broadcast %10 : vector<48x1xf32> to vector<48x128xf32>
    %14 = arith.addf %12, %13 : vector<48x128xf32>
    %cst_11 = arith.constant 0.000000e+00 : f32
    %15 = vector.broadcast %cst_11 : f32 to vector<48x128xf32>
    %16 = arith.maximumf %14, %15 : vector<48x128xf32>
    %c0_12 = arith.constant 0 : index
    %c0_13 = arith.constant 0 : index
    %17 = vector.load %arg6[%c0_12, %c0_13] : memref<32x48xbf16, #tpu.memory_space<vmem>>, vector<32x48xbf16>
    %c0_14 = arith.constant 0 : index
    %c0_15 = arith.constant 0 : index
    %18 = vector.load %arg7[%c0_14, %c0_15] : memref<32x1xf32, #tpu.memory_space<vmem>>, vector<32x1xf32>
    %19 = arith.truncf %16 : vector<48x128xf32> to vector<48x128xbf16>
    %cst_16 = arith.constant dense<0.000000e+00> : vector<32x128xf32>
    %20 = tpu.matmul %17, %19, %cst_16 {dimension_numbers = #tpu.dot_dimension_numbers<[1], [0], [0], [1], [0, 0, 1, 1], [], []>} : vector<32x48xbf16>, vector<48x128xbf16>, vector<32x128xf32> -> vector<32x128xf32>
    %21 = vector.broadcast %18 : vector<32x1xf32> to vector<32x128xf32>
    %22 = arith.addf %20, %21 : vector<32x128xf32>
    %cst_17 = arith.constant 0.000000e+00 : f32
    %23 = vector.broadcast %cst_17 : f32 to vector<32x128xf32>
    %24 = arith.maximumf %22, %23 : vector<32x128xf32>
    %c0_18 = arith.constant 0 : index
    %c0_19 = arith.constant 0 : index
    %25 = vector.load %arg8[%c0_18, %c0_19] : memref<32x1xf32, #tpu.memory_space<vmem>>, vector<32x1xf32>
    %c0_20 = arith.constant 0 : index
    %c0_21 = arith.constant 0 : index
    %26 = memref.load %arg9[%c0_20, %c0_21] : memref<1x1xf32, #tpu.memory_space<smem>>
    %27 = vector.broadcast %25 : vector<32x1xf32> to vector<32x128xf32>
    %28 = arith.mulf %24, %27 : vector<32x128xf32>
    %cst_22 = arith.constant dense<0.000000e+00> : vector<128xf32>
    %29 = vector.multi_reduction <add>, %28, %cst_22 [0] : vector<32x128xf32> to vector<128xf32>
    %30 = vector.shape_cast %29 : vector<128xf32> to vector<1x128xf32>
    %31 = vector.broadcast %26 : f32 to vector<1x128xf32>
    %32 = arith.addf %30, %31 : vector<1x128xf32>
    %c0_23 = arith.constant 0 : index
    %c0_24 = arith.constant 0 : index
    %33 = vector.load %arg10[%c0_23, %c0_24] : memref<1x128xf32, #tpu.memory_space<vmem>>, vector<1x128xf32>
    tpu.vector_store %arg10[%c0_23, %c0_24], %32 {strides = array<i32>} : memref<1x128xf32, #tpu.memory_space<vmem>>, vector<1x128xf32>,
    return
  }
  func.func @transform_0(%arg0: i32) -> (i32, i32) {
    %c0_i32 = arith.constant 0 : i32
    %c0_i32_0 = arith.constant 0 : i32
    return %arg0, %c0_i32 : i32, i32
  }
  func.func @transform_1(%arg0: i32) -> (i32, i32) {
    %c0_i32 = arith.constant 0 : i32
    %c0_i32_0 = arith.constant 0 : i32
    %c0_i32_1 = arith.constant 0 : i32
    return %c0_i32, %c0_i32_0 : i32, i32
  }
  func.func @transform_2(%arg0: i32) -> (i32, i32) {
    %c0_i32 = arith.constant 0 : i32
    %c0_i32_0 = arith.constant 0 : i32
    %c0_i32_1 = arith.constant 0 : i32
    return %c0_i32, %c0_i32_0 : i32, i32
  }
  func.func @transform_3(%arg0: i32) -> (i32, i32) {
    %c0_i32 = arith.constant 0 : i32
    %c0_i32_0 = arith.constant 0 : i32
    %c0_i32_1 = arith.constant 0 : i32
    return %c0_i32, %c0_i32_0 : i32, i32
  }
  func.func @transform_4(%arg0: i32) -> (i32, i32) {
    %c0_i32 = arith.constant 0 : i32
    %c0_i32_0 = arith.constant 0 : i32
    %c0_i32_1 = arith.constant 0 : i32
    return %c0_i32, %c0_i32_0 : i32, i32
  }
  func.func @transform_5(%arg0: i32) -> (i32, i32) {
    %c0_i32 = arith.constant 0 : i32
    %c0_i32_0 = arith.constant 0 : i32
    %c0_i32_1 = arith.constant 0 : i32
    return %c0_i32, %c0_i32_0 : i32, i32
  }
  func.func @transform_6(%arg0: i32) -> (i32, i32) {
    %c0_i32 = arith.constant 0 : i32
    %c0_i32_0 = arith.constant 0 : i32
    %c0_i32_1 = arith.constant 0 : i32
    return %c0_i32, %c0_i32_0 : i32, i32
  }
  func.func @transform_7(%arg0: i32) -> (i32, i32) {
    %c0_i32 = arith.constant 0 : i32
    %c0_i32_0 = arith.constant 0 : i32
    %c0_i32_1 = arith.constant 0 : i32
    return %c0_i32, %c0_i32_0 : i32, i32
  }
  func.func @transform_8(%arg0: i32) -> (i32, i32) {
    %c0_i32 = arith.constant 0 : i32
    %c0_i32_0 = arith.constant 0 : i32
    %c0_i32_1 = arith.constant 0 : i32
    return %c0_i32, %c0_i32_0 : i32, i32
  }
  func.func @transform_9(%arg0: i32) -> (i32, i32) {
    %c0_i32 = arith.constant 0 : i32
    %c0_i32_0 = arith.constant 0 : i32
    return %c0_i32, %arg0 : i32, i32
  }
}

</mosaic_0001>

<bundles_post_ra>
// kernel: tpu_custom_call.1
= control target key start
LH: loop header
LB: loop body
LE: loop exit
PB: predicated region body
PF: predicated region fallthrough
CT: control target
= control target key end

     0   :  { %s1247_s0 = inlined_call_operand.vmem [shape: f32[200,32], index: 0, kind: input, shape index: {}]   ;;  %s1248_s1 = inlined_call_operand.vmem [shape: bf16[64,32], index: 1, kind: input, shape index: {}]   ;;  %s1249_s2 = inlined_call_operand.vmem [shape: f32[64,1], index: 2, kind: input, shape index: {}]   ;;  %s1250_s3 = inlined_call_operand.vmem [shape: bf16[48,64], index: 3, kind: input, shape index: {}]   ;;  %s1251_s4 = inlined_call_operand.vmem [shape: f32[48,1], index: 4, kind: input, shape index: {}]   ;;  %s1252_s5 = inlined_call_operand.vmem [shape: bf16[32,48], index: 5, kind: input, shape index: {}]   ;;  %s1253_s6 = inlined_call_operand.vmem [shape: f32[32,1], index: 6, kind: input, shape index: {}]   ;;  %s1254_s7 = inlined_call_operand.vmem [shape: f32[32,1], index: 7, kind: input, shape index: {}]   ;;  %s1255_s8 = inlined_call_operand.<no memory space> [shape: f32[1,1], index: 8, kind: input, shape index: {}]   ;;  %s1256_s9 = inlined_call_operand.hbm [shape: f32[1,200], index: 9, kind: output, shape index: {}]  }
   0x1   :  { %14 = sst [smem:[#allocation2]] %s1255_s8 }
   0x2   :  { %15 = vsyncpa [#allocation4], 0 }
   0x3   :  { %17 = vsyncpa [#allocation4 + $0x1], 0  ;;  %s1040_s11 = smov 0   ;;  %s1042_s12 = smov 0  }
   0x4   :  { %s1044_s13 = smov 0   ;;  %s1046_s14 = smov 0  }
   0x5 LB: > { %s1061_s8 = sadd.s32 4294967295, %s984_s14   ;;  %s809_s15 = sadd.s32 4294967294, %s984_s14   ;;  %s984_s14 = sphi %s1046_s14, %s1262_s14   ;;  %s980_s13 = sphi %s1044_s13, %s1261_s13   ;;  %s976_s12 = sphi %s1042_s12, %s1260_s12   ;;  %s972_s11 = sphi %s1040_s11, %s1259_s11  }
   0x6   : > { %s1065_s16 = sadd.s32 1, %s984_s14   ;;  %s224_s17 = sadd.s32 1, %s980_s13 }
   0x7   : > { %s221_s18 = ssub.s32 %s984_s14, %s1065_s16  ;;  %p234_p0 = scmp.ne.s32.totalorder %s980_s13, %s976_s12 }
   0x8   : > { %p222_p1 = scmp.eq.s32.totalorder %s221_s18, 0  ;;  %p235_p2 = scmp.eq.s32.totalorder %s1061_s8, 1 }
   0x9   : > { %p240_p3 = scmp.ne.s32.totalorder %s976_s12, %s972_s11  ;;  %p241_p4 = scmp.eq.s32.totalorder %s809_s15, 1 }
   0xa   : > { %s1076_s19 = scalar_select %p222_p1, %s980_s13, %s224_s17  }
   0xb   : > { %p1078_p5 = por %p235_p2, %p234_p0  ;;  %p1082_p6 = por %p241_p4, %p240_p3 }
   0xc   : > { %p812_p7 = scmp.ge.s32.totalorder %s984_s14, 1  ;;  %p300_p8 = scmp.lt.s32.totalorder %s984_s14, 3 }
   0xe   : > { %p301_p9 = pnand %p812_p7, %p300_p8 }
   0xf   : > { %s813_s22 = sshll.u32 (!%p301_p9), %s1061_s8, 4  ;;  %s704_s24 = sld [smem:[#allocation2]] (!%p301_p9) }
  0x10   : > { %304 = sbr.rel (%p301_p9) target bundleno = 648 (0x288), region = 56  ;;  %p344_p10 = scmp.lt.s32.totalorder (!%p301_p9), %s813_s22, 24 }
  0x11   : > { %s337_s25 = sand.u32 (!%p301_p9), 1, %s976_s12   ;;  %s750_s29 = scalar_lea.hbm (!%p301_p9), %s1256_s9, %s1061_s8 }
  0x12   : > { %s338_s30 = scalar_lea.vmem (!%p301_p9), [#allocation3], %s337_s25  ;;  %s754_s10 = sshll.u32 (!%p301_p9), %s750_s29, 4  ;;  %s755_s10 = int_to_ptr.hbm [resolvable:$true] %s754_s10 }
  0x13   : > { %s742_s15 = scalar_lea.sflag (!%p301_p9), [#allocation4], %s337_s25  ;;  %s936_s17 = sshra.s32 (!%p301_p9), %s755_s10, 4  ;;  %s937_s17 = int_to_ptr.hbm [resolvable:$true] %s936_s17 }
  0x14   : > { %s938_s18 = scalar_lea.hbm (!%p301_p9), %s937_s17, 1  ;;  %p943_p0 = scmp.lt.s32.totalorder (!%p301_p9), %s937_s17, %s1256_s9 }
  0x15   : > { %s1264_s22 = smov (!%p344_p10, %s813_s22), 24  ;;  %vm454_vm0 = vcmask 261120   ;;  %v392_v14 = vld [vmem:[%s1249_s2 + $0x30] sm:$0xff]  ;;  %v986_v16 = vmov 0   ;;  %v393_v24 = vld [vmem:[%s1249_s2 + $0x38] sm:$0xff]  ;;  %v390_v25 = vld [vmem:[%s1249_s2 + $0x20] sm:$0xff]  ;;  %p939_p11 = scmp.ne.s32.totalorder %s937_s17, %s938_s18 }
  0x16   : > { %s814_s23 = sshll.u32 %s1264_s22, 3  ;;  %919 = vset.pattern.permute.xlu0 %v986_v16  ;;  %920 = vset.pattern.permute.xlu1 %v986_v16  ;;  %v386_v30 = vld [vmem:[%s1249_s2] sm:$0xff]  ;;  %v391_v31 = vld [vmem:[%s1249_s2 + $0x28] sm:$0xff]  ;;  %v536_v41 = vld [vmem:[%s1251_s4 + $0x10] sm:$0xff]  ;;  %vm589_vm1 = vcmask 523264   ;;  %vm670_vm2 = vcmask 392192  }
  0x17   : > { %s1092_s26 = scalar_lea.vmem %s1247_s0, %s814_s23  ;;  %426 = vperm.xlu0 %919, %v392_v14   ;;  %921 = vset.pattern.permute.xlu2 %v986_v16  ;;  %v539_v36 = vld [vmem:[%s1251_s4 + $0x28] sm:$0xff]  ;;  %v534_v40 = vld [vmem:[%s1251_s4] sm:$0xff]  ;;  %v388_v44 = vld [vmem:[%s1249_s2 + $0x10] sm:$0xff]  ;;  %p940_p12 = pnand %p939_p11, %p1078_p5 }
  0x18   : > { %v368_v0 = vld [vmem:[%s1092_s26 + $0x70] sm:$0xff]  ;;  %v369_v1 = vld [vmem:[%s1092_s26 + $0x78] sm:$0xff]  ;;  %v366_v3 = vld [vmem:[%s1092_s26 + $0x60] sm:$0xff]  ;;  %416 = vperm.xlu1 %920, %v390_v25   ;;  %406 = vperm.xlu2 %921, %v388_v44   ;;  %s942_s23 = scalar_lea.hbm %s1256_s9, 2 }
  0x19   : > { %v377_v2 = vpack.c.bf16 %v369_v1, %v368_v0  ;;  %v367_v4 = vld [vmem:[%s1092_s26 + $0x68] sm:$0xff]  ;;  %v364_v8 = vld [vmem:[%s1092_s26 + $0x50] sm:$0xff]  ;;  %v365_v9 = vld [vmem:[%s1092_s26 + $0x58] sm:$0xff]  ;;  %p941_p13 = pneg %p940_p12  ;;  %p944_p1 = scmp.lt.s32.totalorder %s942_s23, %s938_s18 }
  0x1a   : > { %v376_v6 = vpack.c.bf16 %v367_v4, %v366_v3  ;;  %v375_v10 = vpack.c.bf16 %v365_v9, %v364_v8  ;;  %v362_v12 = vld [vmem:[%s1092_s26 + $0x40] sm:$0xff]  ;;  %v363_v13 = vld [vmem:[%s1092_s26 + $0x48] sm:$0xff]  ;;  %v360_v18 = vld [vmem:[%s1092_s26 + $0x30] sm:$0xff] }
  0x1b   : > { %v489_v5 = vsel %vm454_vm0, %v377_v2, 0  ;;  %v374_v15 = vpack.c.bf16 %v363_v13, %v362_v12  ;;  %v361_v19 = vld [vmem:[%s1092_s26 + $0x38] sm:$0xff]  ;;  %v358_v22 = vld [vmem:[%s1092_s26 + $0x20] sm:$0xff]  ;;  %v359_v23 = vld [vmem:[%s1092_s26 + $0x28] sm:$0xff]  ;;  %p945_p2 = por %p944_p1, %p943_p0 }
  0x1c   : > { %871 = vmatpush.bf16.xpose.msra.mxu3 %v489_v5  ;;  %491 = vmatpush.bf16.xpose.msra.mxu0 %v489_v5  ;;  %v486_v7 = vsel %vm454_vm0, %v376_v6, 0  ;;  %v483_v11 = vsel %vm454_vm0, %v375_v10, 0  ;;  %v373_v20 = vpack.c.bf16 %v361_v19, %v360_v18  ;;  %v372_v26 = vpack.c.bf16 %v359_v23, %v358_v22  ;;  %v356_v28 = vld [vmem:[%s1092_s26 + $0x10] sm:$0xff]  ;;  %v357_v29 = vld [vmem:[%s1092_s26 + $0x18] sm:$0xff]  ;;  %v354_v34 = vld [vmem:[%s1092_s26] sm:$0xff] }
  0x1d   : > { %v480_v17 = vsel %vm454_vm0, %v374_v15, 0  ;;  %v371_v32 = vpack.c.bf16 %v357_v29, %v356_v28  ;;  %v355_v35 = vld [vmem:[%s1092_s26 + $0x8] sm:$0xff]  ;;  %v862_v43 = vld [vmem:[%s1248_s1] sm:$0xff]  ;;  %v389_v47 = vld [vmem:[%s1249_s2 + $0x18] sm:$0xff]  ;;  %s752_s26 = sshll.u32 %s338_s30, 4  ;;  %p946_p3 = pnand %p945_p2, %p941_p13  ;;  %s753_s26 = int_to_ptr.vmem [resolvable:$true] %s752_s26 }
  0x1e   : > { %v477_v21 = vsel %vm454_vm0, %v373_v20, 0  ;;  %v474_v27 = vsel %vm454_vm0, %v372_v26, 0  ;;  %v387_v37 = vld [vmem:[%s1249_s2 + $0x8] sm:$0xff]  ;;  %v370_v38 = vpack.c.bf16 %v355_v35, %v354_v34  ;;  %v700_v48 = vld [vmem:[%s1254_s7] sm:$0xff]  ;;  %v635_v49 = vld [vmem:[%s1253_s6 + $0x10] sm:$0xff] }
  0x1f   : > { %431 = vperm.xlu0 %919, %v393_v24   ;;  %v471_v33 = vsel %vm454_vm0, %v371_v32, 0  ;;  %v863_v42 = vld [vmem:[%s1248_s1 + $0x8] sm:$0xff]  ;;  %v864_v50 = vld [vmem:[%s1248_s1 + $0x10] sm:$0xff]  ;;  %v538_v51 = vld [vmem:[%s1251_s4 + $0x20] sm:$0xff] }
  0x20   : > { %421 = vperm.xlu1 %920, %v391_v31   ;;  %v468_v39 = vsel %vm454_vm0, %v370_v38, 0  ;;  %v634_v45 = vld [vmem:[%s1253_s6 + $0x8] sm:$0xff]  ;;  %411 = vperm.xlu2 %921, %v389_v47   ;;  %v703_v52 = vld [vmem:[%s1254_s7 + $0x18] sm:$0xff]  ;;  %v633_v56 = vld [vmem:[%s1253_s6] sm:$0xff] }
  0x21   : > { %v535_v46 = vld [vmem:[%s1251_s4 + $0x8] sm:$0xff]  ;;  %v537_v54 = vld [vmem:[%s1251_s4 + $0x18] sm:$0xff]  ;;  %v702_v58 = vld [vmem:[%s1254_s7 + $0x10] sm:$0xff] }
  0x22   : > { %v701_v53 = vld [vmem:[%s1254_s7 + $0x8] sm:$0xff]  ;;  %v865_v55 = vld [vmem:[%s1248_s1 + $0x18] sm:$0xff]  ;;  %v866_v31 = vld [vmem:[%s1250_s3] sm:$0xff] }
  0x23   : > { %v636_v57 = vld [vmem:[%s1253_s6 + $0x18] sm:$0xff]  ;;  %v867_v32 = vld [vmem:[%s1250_s3 + $0x8] sm:$0xff] }
  0x24   : > { %872 = vmatpush.bf16.xpose.msra.mxu3 %v486_v7  ;;  %492 = vmatpush.bf16.xpose.msra.mxu0 %v486_v7 }
  0x27   : > { %396 = vperm.xlu0 %919, %v386_v30  }
  0x28   : > { %401 = vperm.xlu1 %920, %v387_v37   ;;  %566 = vperm.xlu2 %921, %v538_v51  }
  0x2c   : > { %873 = vmatpush.bf16.xpose.msra.mxu3 %v483_v11  ;;  %493 = vmatpush.bf16.xpose.msra.mxu0 %v483_v11 }
  0x2f   : > { %571 = vperm.xlu0 %919, %v539_v36  }
  0x30   : > { %556 = vperm.xlu1 %920, %v536_v41   ;;  %561 = vperm.xlu2 %921, %v537_v54  }
  0x34   : > { %874 = vmatpush.bf16.xpose.msra.mxu3 %v480_v17  ;;  %494 = vmatpush.bf16.xpose.msra.mxu0 %v480_v17 }
  0x37   : > { %546 = vperm.xlu0 %919, %v534_v40  }
  0x38   : > { %551 = vperm.xlu1 %920, %v535_v46   ;;  %642 = vperm.xlu2 %921, %v633_v56  }
  0x3c   : > { %875 = vmatpush.bf16.xpose.msra.mxu3 %v477_v21  ;;  %495 = vmatpush.bf16.xpose.msra.mxu0 %v477_v21 }
  0x3f   : > { %647 = vperm.xlu0 %919, %v634_v45  }
  0x40   : > { %652 = vperm.xlu1 %920, %v635_v49   ;;  %657 = vperm.xlu2 %921, %v636_v57  }
  0x44   : > { %876 = vmatpush.bf16.xpose.msra.mxu3 %v474_v27  ;;  %496 = vmatpush.bf16.xpose.msra.mxu0 %v474_v27 }
  0x47   : > { %707 = vperm.xlu0 %919, %v700_v48  }
  0x48   : > { %712 = vperm.xlu1 %920, %v701_v53   ;;  %717 = vperm.xlu2 %921, %v702_v58  }
  0x4c   : > { %877 = vmatpush.bf16.xpose.msra.mxu3 %v471_v33  ;;  %497 = vmatpush.bf16.xpose.msra.mxu0 %v471_v33  ;;  %v868_v33 = vld [vmem:[%s1250_s3 + $0x10] sm:$0xff] }
  0x4f   : > { %722 = vperm.xlu0 %919, %v703_v52  }
  0x54   : > { %878 = vmatpush.bf16.xpose.msra.mxu3 %v468_v39  ;;  %498 = vmatpush.bf16.xpose.msra.mxu0 %v468_v39 }
  0x5b   : > { %832 = vmatmul.msk.bf16.vlgmr.msra.gmra.mxu3 %vm454_vm0, %v863_v42  ;;  %831 = vmatmul.msk.bf16.vlgmr.msra.gmra.mxu0 %vm454_vm0, %v862_v43 }
  0x6b   : > { %833 = vmatmul.msk.bf16.gmra.mxu3 %vm454_vm0, %v864_v50 }
  0x72   : > { %v407_v2 = vpop.permute.xlu2 %406 }
  0x7a   : > { %v412_v13 = vpop.permute.xlu2 %411 }
  0x7b   : > { %834 = vmatmul.msk.bf16.gmra.mxu3 %vm454_vm0, %v865_v55 }
  0x82   : > { %v567_v38 = vpop.permute.xlu2 %566 }
  0x89   : > { %v427_v63 = vpop.permute.xlu0 %426 }
  0x8a   : > { %v417_v0 = vpop.permute.xlu1 %416  ;;  %v562_v43 = vpop.permute.xlu2 %561 }
  0x91   : > { %v432_v4 = vpop.permute.xlu0 %431 }
  0x92   : > { %v422_v5 = vpop.permute.xlu1 %421 }
  0x99   : > { %v397_v20 = vpop.permute.xlu0 %396 }
  0x9a   : > { %v402_v21 = vpop.permute.xlu1 %401 }
  0xa1   : > { %v572_v41 = vpop.permute.xlu0 %571 }
  0xa2   : > { %v557_v40 = vpop.permute.xlu1 %556 }
  0xa9   : > { %v547_v54 = vpop.permute.xlu0 %546 }
  0xaa   : > { %v552_v50 = vpop.permute.xlu1 %551 }
  0xd8   : > { %v500_v3 = vpop.f32.mrf.mxu0 }
  0xd9   : > { %v501_v23 = vadd.f32 %v500_v3, %v397_v20  ;;  %v653_v3 = vpop.permute.xlu1 %652 }
  0xdb   : > { %v520_v27 = vmax.f32 %v501_v23, 0.0 }
  0xde   : > { %v505_v59 = vpop.f32.mrf.mxu3 }
  0xdf   : > { %v506_v18 = vadd.f32 %v505_v59, %v407_v2 }
  0xe0   : > { %v502_v17 = vpop.f32.mrf.mxu0 }
  0xe1   : > { %v503_v24 = vadd.f32 %v502_v17, %v402_v21  ;;  %v522_v26 = vmax.f32 %v506_v18, 0.0 }
  0xe3   : > { %v521_v28 = vmax.f32 %v503_v24, 0.0 }
  0xe5   : > { %v540_v30 = vpack.c.bf16 %v521_v28, %v520_v27 }
  0xe6   : > { %v507_v60 = vpop.f32.mrf.mxu3 }
  0xe7   : > { %v508_v14 = vadd.f32 %v507_v60, %v412_v13  ;;  %v713_v13 = vpop.permute.xlu1 %712 }
  0xe9   : > { %v523_v22 = vmax.f32 %v508_v14, 0.0 }
  0xeb   : > { %v541_v29 = vpack.c.bf16 %v523_v22, %v522_v26 }
  0xee   : > { %v510_v61 = vpop.f32.mrf.mxu3 }
  0xef   : > { %v511_v10 = vadd.f32 %v510_v61, %v417_v0  ;;  %v869_v61 = vld [vmem:[%s1252_s5] sm:$0xff]  ;;  %v643_v0 = vpop.permute.xlu2 %642 }
  0xf1   : > { %v524_v19 = vmax.f32 %v511_v10, 0.0 }
  0xf6   : > { %v512_v62 = vpop.f32.mrf.mxu3 }
  0xf7   : > { %v513_v8 = vadd.f32 %v512_v62, %v422_v5  ;;  %v870_v62 = vld [vmem:[%s1252_s5 + $0x8] sm:$0xff] }
  0xf9   : > { %v525_v15 = vmax.f32 %v513_v8, 0.0 }
  0xfb   : > { %v542_v25 = vpack.c.bf16 %v525_v15, %v524_v19 }
  0xfe   : > { %v515_v1 = vpop.f32.mrf.mxu3 }
  0xff   : > { %v516_v6 = vadd.f32 %v515_v1, %v427_v63  ;;  %v648_v1 = vpop.permute.xlu0 %647 }
 0x101   : > { %v526_v11 = vmax.f32 %v516_v6, 0.0 }
 0x106   : > { %v517_v7 = vpop.f32.mrf.mxu3 }
 0x107   : > { %v518_v9 = vadd.f32 %v517_v7, %v432_v4  ;;  %v658_v4 = vpop.permute.xlu2 %657 }
 0x109   : > { %v527_v12 = vmax.f32 %v518_v9, 0.0  ;;  %v708_v9 = vpop.permute.xlu0 %707 }
 0x10b   : > { %v543_v16 = vpack.c.bf16 %v527_v12, %v526_v11 }
 0x10d   : > { %603 = vmatpush.bf16.msra.mxu1 %v543_v16 }
 0x10f   : > { %v718_v15 = vpop.permute.xlu2 %717 }
 0x111   : > { %604 = vmatpush.bf16.msra.mxu1 %v542_v25  ;;  %v723_v22 = vpop.permute.xlu0 %722 }
 0x115   : > { %605 = vmatpush.bf16.msra.mxu1 %v541_v29 }
 0x119   : > { %606 = vmatpush.bf16.msra.mxu1 %v540_v30 }
 0x11c   : > { %847 = vmatmul.msk.bf16.vlgmr.msra.gmra.mxu1 %vm589_vm1, %v866_v31  ;;  %v738_v31 = vstv %s704_s24 }
 0x12c   : > { %848 = vmatmul.msk.bf16.gmra.mxu1 %vm589_vm1, %v867_v32 }
 0x13c   : > { %849 = vmatmul.msk.bf16.gmra.mxu1 %vm589_vm1, %v868_v33 }
 0x199   : > { %v608_v34 = vpop.f32.mrf.mxu1 }
 0x19a   : > { %v609_v55 = vadd.f32 %v608_v34, %v547_v54 }
 0x19c   : > { %v623_v59 = vmax.f32 %v609_v55, 0.0 }
 0x1a1   : > { %v610_v35 = vpop.f32.mrf.mxu1 }
 0x1a2   : > { %v611_v51 = vadd.f32 %v610_v35, %v552_v50 }
 0x1a4   : > { %v624_v57 = vmax.f32 %v611_v51, 0.0 }
 0x1a6   : > { %v637_v60 = vpack.c.bf16 %v624_v57, %v623_v59 }
 0x1a9   : > { %v613_v36 = vpop.f32.mrf.mxu1 }
 0x1aa   : > { %v614_v47 = vadd.f32 %v613_v36, %v557_v40 }
 0x1ac   : > { %v625_v56 = vmax.f32 %v614_v47, 0.0 }
 0x1b1   : > { %v615_v37 = vpop.f32.mrf.mxu1 }
 0x1b2   : > { %v616_v45 = vadd.f32 %v615_v37, %v562_v43 }
 0x1b4   : > { %v626_v52 = vmax.f32 %v616_v45, 0.0 }
 0x1b6   : > { %v638_v58 = vpack.c.bf16 %v626_v52, %v625_v56 }
 0x1b9   : > { %v618_v39 = vpop.f32.mrf.mxu1 }
 0x1ba   : > { %v619_v42 = vadd.f32 %v618_v39, %v567_v38 }
 0x1bc   : > { %v627_v48 = vmax.f32 %v619_v42, 0.0 }
 0x1c1   : > { %v620_v44 = vpop.f32.mrf.mxu1 }
 0x1c2   : > { %v621_v46 = vadd.f32 %v620_v44, %v572_v41 }
 0x1c4   : > { %v628_v49 = vmax.f32 %v621_v46, 0.0 }
 0x1c6   : > { %v639_v53 = vpack.c.bf16 %v628_v49, %v627_v48 }
 0x1c8   : > { %682 = vmatpush.bf16.msra.mxu2 %v639_v53 }
 0x1cc   : > { %683 = vmatpush.bf16.msra.mxu2 %v638_v58 }
 0x1d0   : > { %684 = vmatpush.bf16.msra.mxu2 %v637_v60 }
 0x1d3   : > { %858 = vmatmul.msk.bf16.vlgmr.msra.gmra.mxu2 %vm670_vm2, %v869_v61 }
 0x1e3   : > { %859 = vmatmul.msk.bf16.gmra.mxu2 %vm670_vm2, %v870_v62 }
 0x256   : > { %v686_v63 = vpop.f32.mrf.mxu2 }
 0x257   : > { %v687_v7 = vadd.f32 %v686_v63, %v643_v0 }
 0x259   : > { %v696_v11 = vmax.f32 %v687_v7, 0.0 }
 0x25b   : > { %v725_v17 = vmul.f32 %v708_v9, %v696_v11 }
 0x25e   : > { %v688_v2 = vpop.f32.mrf.mxu2 }
 0x25f   : > { %v689_v5 = vadd.f32 %v688_v2, %v648_v1 }
 0x261   : > { %v697_v10 = vmax.f32 %v689_v5, 0.0 }
 0x263   : > { %v726_v14 = vmul.f32 %v713_v13, %v697_v10 }
 0x265   : > { %v729_v20 = vadd.f32 %v726_v14, %v725_v17 }
 0x266   : > { %v691_v6 = vpop.f32.mrf.mxu2 }
 0x267   : > { %v692_v8 = vadd.f32 %v691_v6, %v653_v3 }
 0x269   : > { %v698_v12 = vmax.f32 %v692_v8, 0.0 }
 0x26b   : > { %v727_v18 = vmul.f32 %v718_v15, %v698_v12 }
 0x26d   : > { %v730_v23 = vadd.f32 %v729_v20, %v727_v18 }
 0x26e   : > { %v693_v16 = vpop.f32.mrf.mxu2 }
 0x26f   : > { %v694_v19 = vadd.f32 %v693_v16, %v658_v4 }
 0x271   : > { %v699_v21 = vmax.f32 %v694_v19, 0.0 }
 0x273   : > { %v728_v24 = vmul.f32 %v723_v22, %v699_v21 }
 0x275   : > { %v731_v25 = vadd.f32 %v730_v23, %v728_v24 }
 0x277   : > { %v732_v26 = vrot.slane %v731_v25, 4 }
 0x279   : > { %v733_v27 = vadd.f32 %v732_v26, %v731_v25 }
 0x27b   : > { %v734_v28 = vrot.slane %v733_v27, 2 }
 0x27d   : > { %v735_v29 = vadd.f32 %v734_v28, %v733_v27 }
 0x27f   : > { %v736_v30 = vrot.slane %v735_v29, 1 }
 0x281   : > { %v737_v32 = vadd.f32 %v736_v30, %v735_v29 }
 0x283   : > { %v739_v33 = vadd.f32 %v738_v31, %v737_v32 }
 0x285   : > { %740 = vst [vmem:[%s338_s30] sm:$0x1] %v739_v33 }
 0x286   : > { %949 = shalt.err (!%p946_p3)
}
 0x287   : > { %879 = dma.vmem_to_hbm [thread:$0]  (%p1078_p5), %s753_s26, 16, %s755_s10, %s742_s15  }
 0x288 PF: > { %p885_p4 = scmp.ge.s32.totalorder %s984_s14, 2  ;;  %s766_s25 = sand.u32 1, %s972_s11  }
 0x289   : > { %s767_s28 = scalar_lea.sflag [#allocation4], %s766_s25 }
 0x28a   : > { %p882_p7 = pnand %p885_p4, %p1082_p6 }
 0x28c   : > { %p883_p8 = pneg %p882_p7 }
 0x28e   : > { %967 = dma.done.wait (%p883_p8), %s767_s28, 16  }
 0x28f   : > { %969 = vsyncadd (%p883_p8), %s767_s28, 4294967280  ;;  %p20_p9 = scmp.ge.s32.totalorder %s1065_s16, 4   ;;  %s1259_s11 = smov %s976_s12 }
 0x290   : > { %s1260_s12 = smov %s980_s13  ;;  %s1261_s13 = smov %s1076_s19 }
 0x291   : > { %s1262_s14 = smov %s1065_s16  ;;  %22 = sbr.rel (!%p20_p9) target bundleno = 5 (0x5), region = 91 }
 0x296   :  { %772 = vsyncpa [#allocation4], 1 }
 0x297   :  { %774 = vsyncpa [#allocation4 + $0x1], 1 }

</bundles_post_ra>
